<compile_context>
chip_gen: v6e
topology: v6e:2x2x1
jax: 0.10.0
libtpu: 0.0.40
codegen_flags: <defaults>
</compile_context>

<pallas_src>
import functools

import jax
import jax.numpy as jnp
from jax.experimental import pallas as pl
from jax.experimental.pallas import tpu as pltpu


def _round_up(x, m):
    return ((x + m - 1) // m) * m


def _cdiv(a, b):
    return (a + b - 1) // b


_N_CHUNKS = 8  # one output sublane row per chunk


# ----------------------------------------------------------------------------
# Fused kernel: onehot @ fused_table  +  feat @ W1_feat  -> ReLU -> dot(w2) + b2
# ----------------------------------------------------------------------------
def _pitch_count_kernel(ids_ref, feat_ref, table_ref, w1f_ref, w2_ref, b2_ref, o_ref):
    # ids_ref   (tb, 1) int32       feat_ref (tb, D) f32
    # table_ref (P, H) f32          w1f_ref  (D, H)  f32
    # w2_ref    (1, H) f32          b2_ref   (1,)    f32  (SMEM)
    # o_ref     (1, 8, tb//8) f32   (batch laid out sublane-major x lane)
    tb = feat_ref.shape[0]
    num_pitchers = table_ref.shape[0]
    c_rows = tb // _N_CHUNKS

    # Static unroll over the 8 output sublane rows: bounds the live (c_rows, P)
    # one-hot / (c_rows, H) hidden working set and keeps every ref index static.
    for c in range(_N_CHUNKS):
        r0 = c * c_rows
        ids = ids_ref[pl.ds(r0, c_rows), :]                    # (C, 1) int32
        feat = feat_ref[pl.ds(r0, c_rows), :]                  # (C, D) f32

        # Embedding "gather" fused with layer 1: one-hot compare + MXU matmul
        # against the pre-fused (P, H) table (= emb @ W1_emb + b1).
        iota = jax.lax.broadcasted_iota(jnp.int32, (c_rows, num_pitchers), 1)
        onehot = (iota == ids).astype(jnp.float32)             # (C, P)
        h = jnp.dot(onehot, table_ref[...],
                    preferred_element_type=jnp.float32)        # emb @ W1e + b1
        h = h + jnp.dot(feat, w1f_ref[...],
                        preferred_element_type=jnp.float32)    # + feat @ W1f
        h = jnp.maximum(h, 0.0)                                # ReLU (VPU)

        # Second Linear (out_features = 1): VPU multiply + lane reduce (no N=1
        # MXU matmul).  Result goes lane-dense into output sublane row `c`.
        o = jnp.sum(h * w2_ref[...], axis=-1) + b2_ref[0]      # (C,)
        o_ref[0, c, :] = o.astype(o_ref.dtype)


def _choose_tile(batch, tile_b):
    """Sublane-aligned batch tile; prefer >= 2 grid steps (v7x two-core sharding)."""
    tb = min(tile_b, _round_up(batch, 8))
    tb = max(8, _round_up(tb, 8))
    if _cdiv(batch, tb) < 2 and batch > 8:
        tb = max(8, _round_up(_cdiv(batch, 2), 8))
    return tb


@functools.partial(jax.jit, static_argnames=("tile_b",))
def _fused_forward(pitcher_id, features, table, w1_feat, w2_row, b2, tile_b=4096):
    B, D = features.shape
    P, H = table.shape

    tb = _choose_tile(B, tile_b)
    n_tiles = _cdiv(B, tb)              # partial tail block handled by Pallas padding
    lanes = tb // _N_CHUNKS

    ids2d = pitcher_id.astype(jnp.int32).reshape(B, 1)
    features = features.astype(jnp.float32)

    out = pl.pallas_call(
        _pitch_count_kernel,
        out_shape=jax.ShapeDtypeStruct((n_tiles, _N_CHUNKS, lanes), jnp.float32),
        grid=(n_tiles,),
        in_specs=[
            pl.BlockSpec((tb, 1), lambda i: (i, 0)),            # pitcher ids (streamed)
            pl.BlockSpec((tb, D), lambda i: (i, 0)),            # features    (streamed)
            pl.BlockSpec((P, H), lambda i: (0, 0)),             # fused table (resident)
            pl.BlockSpec((D, H), lambda i: (0, 0)),             # W1_feat     (resident)
            pl.BlockSpec((1, H), lambda i: (0, 0)),             # w2 row      (resident)
            pl.BlockSpec(memory_space=pltpu.MemorySpace.SMEM),  # b2 scalar in SMEM
        ],
        out_specs=pl.BlockSpec((1, _N_CHUNKS, lanes), lambda i: (i, 0, 0)),
        compiler_params=pltpu.CompilerParams(
            dimension_semantics=("parallel",)),
    )(ids2d, features, table, w1_feat, w2_row, b2)

    # (n_tiles, 8, tb//8) -> flat batch order (i*tb + s*lanes + l); drop padded tail.
    return out.reshape(n_tiles * tb)[:B].reshape(B, 1)


# ----------------------------------------------------------------------------
# Model wrapper
# ----------------------------------------------------------------------------
class PitchCountModelPallas:
    EMBED_DIM = 16
    HIDDEN = 32   # assumed MLP hidden width (see TODO at top)

    def __init__(self, num_pitchers, input_dim, key):
        k_emb, k_w1, k_b1, k_w2, k_b2 = jax.random.split(key, 5)
        d_in = input_dim + self.EMBED_DIM

        # nn.Embedding default init: N(0, 1)
        self.embedding = jax.random.normal(
            k_emb, (num_pitchers, self.EMBED_DIM), dtype=jnp.float32)

        # nn.Linear default init: U(-1/sqrt(fan_in), 1/sqrt(fan_in))
        lim1 = 1.0 / (d_in ** 0.5)
        w1 = jax.random.uniform(k_w1, (d_in, self.HIDDEN),
                                minval=-lim1, maxval=lim1, dtype=jnp.float32)
        # Split W1 to match torch.cat([embed, features], dim=1): embedding rows first.
        self.w1_emb = w1[:self.EMBED_DIM]                      # (16, H)
        self.w1_feat = w1[self.EMBED_DIM:]                     # (D,  H)
        self.b1 = jax.random.uniform(k_b1, (1, self.HIDDEN),
                                     minval=-lim1, maxval=lim1, dtype=jnp.float32)

        lim2 = 1.0 / (self.HIDDEN ** 0.5)
        self.w2_row = jax.random.uniform(k_w2, (1, self.HIDDEN),
                                         minval=-lim2, maxval=lim2, dtype=jnp.float32)
        self.b2 = jax.random.uniform(k_b2, (1,),
                                     minval=-lim2, maxval=lim2, dtype=jnp.float32)

        # Offline fold: embedding gather + first-layer embedding block + b1 become a
        # single small resident table used by the kernel's one-hot matmul.
        self.table = self.embedding @ self.w1_emb + self.b1    # (P, H)

    def __call__(self, pitcher_id, features, tile_b=4096):
        return _fused_forward(pitcher_id, features, self.table, self.w1_feat,
                              self.w2_row, self.b2, tile_b=tile_b)


# ----------------------------------------------------------------------------
# Pure-JAX reference (unfused path) for correctness check
# ----------------------------------------------------------------------------
def _reference(model, pitcher_id, features):
    emb = jnp.take(model.embedding, pitcher_id, axis=0)
    x = jnp.concatenate([emb, features], axis=1)
    w1 = jnp.concatenate([model.w1_emb, model.w1_feat], axis=0)
    h = jnp.maximum(x @ w1 + model.b1, 0.0)
    return h @ model.w2_row.T + model.b2


if __name__ == "__main__":
    key = jax.random.PRNGKey(0)
    k_model, k_id, k_feat = jax.random.split(key, 3)

    num_pitchers = 10
    input_dim = 16
    batch = 20   # deliberately NOT a multiple of the tile -> exercises the padded tail block

    model = PitchCountModelPallas(num_pitchers, input_dim, k_model)

    pitcher_id = jax.random.randint(k_id, (batch,), 0, num_pitchers, dtype=jnp.int32)
    features = jax.random.normal(k_feat, (batch, input_dim), dtype=jnp.float32)

    # Default tiling -> tb=16, grid=(2,): exercises the multi-step "parallel" batch
    # grid, resident weights, lane-dense output, and the partial tail block.
    out = jax.block_until_ready(model(pitcher_id, features))

    ref = _reference(model, pitcher_id, features)
    assert out.shape == (batch, 1), out.shape
    assert jnp.allclose(out, ref, atol=1e-5, rtol=1e-5), "mismatch vs reference"

    print("KERNEL_OK")
</pallas_src>

<mosaic_0001>
module attributes {stable_mosaic.version = 11 : i64} {
  func.func @_pitch_count_kernel(%arg0: i32, %arg1: memref<16x1xi32, #tpu.memory_space<vmem>>, %arg2: memref<16x16xf32, #tpu.memory_space<vmem>>, %arg3: memref<10x32xf32, #tpu.memory_space<vmem>>, %arg4: memref<16x32xf32, #tpu.memory_space<vmem>>, %arg5: memref<1x32xf32, #tpu.memory_space<vmem>>, %arg6: memref<1xf32, #tpu.memory_space<smem>>, %arg7: memref<1x8x2xf32, #tpu.memory_space<vmem>>) attributes {dimension_semantics = [#tpu.dimension_semantics<parallel>], iteration_bounds = array<i64: 2>, scalar_prefetch = 0 : i64, scratch_operands = 0 : i64, tpu.core_type = #tpu.core_type<tc>, window_params = [{transform_indices = @transform_0, window_bounds = array<i64: 16, 1>}, {transform_indices = @transform_1, window_bounds = array<i64: 16, 16>}, {pipeline_mode = #tpu.pipeline_mode<synchronous>, transform_indices = @transform_2, window_bounds = array<i64: 10, 32>}, {pipeline_mode = #tpu.pipeline_mode<synchronous>, transform_indices = @transform_3, window_bounds = array<i64: 16, 32>}, {pipeline_mode = #tpu.pipeline_mode<synchronous>, transform_indices = @transform_4, window_bounds = array<i64: 1, 32>}, {transform_indices = @transform_5, window_bounds = array<i64: 1>}, {transform_indices = @transform_6, window_bounds = array<i64: 1, 8, 2>}]} {
    %c0 = arith.constant 0 : index
    %c0_0 = arith.constant 0 : index
    %0 = vector.load %arg1[%c0, %c0_0] : memref<16x1xi32, #tpu.memory_space<vmem>>, vector<2x1xi32>
    %c0_1 = arith.constant 0 : index
    %c0_2 = arith.constant 0 : index
    %1 = vector.load %arg2[%c0_1, %c0_2] : memref<16x16xf32, #tpu.memory_space<vmem>>, vector<2x16xf32>
    %2 = tpu.iota {dimensions = array<i32: 1>} : vector<2x10xi32>
    %3 = vector.broadcast %0 : vector<2x1xi32> to vector<2x10xi32>
    %4 = arith.cmpi eq, %2, %3 : vector<2x10xi32>
    %5 = arith.extui %4 : vector<2x10xi1> to vector<2x10xi32>
    %6 = arith.sitofp %5 : vector<2x10xi32> to vector<2x10xf32>
    %c0_3 = arith.constant 0 : index
    %c0_4 = arith.constant 0 : index
    %7 = vector.load %arg3[%c0_3, %c0_4] : memref<10x32xf32, #tpu.memory_space<vmem>>, vector<10x32xf32>
    %cst = arith.constant dense<0.000000e+00> : vector<2x32xf32>
    %8 = tpu.matmul %6, %7, %cst {dimension_numbers = #tpu.dot_dimension_numbers<[1], [0], [0], [1], [0, 0, 1, 1], [], []>} : vector<2x10xf32>, vector<10x32xf32>, vector<2x32xf32> -> vector<2x32xf32>
    %c0_5 = arith.constant 0 : index
    %c0_6 = arith.constant 0 : index
    %9 = vector.load %arg4[%c0_5, %c0_6] : memref<16x32xf32, #tpu.memory_space<vmem>>, vector<16x32xf32>
    %cst_7 = arith.constant dense<0.000000e+00> : vector<2x32xf32>
    %10 = tpu.matmul %1, %9, %cst_7 {dimension_numbers = #tpu.dot_dimension_numbers<[1], [0], [0], [1], [0, 0, 1, 1], [], []>} : vector<2x16xf32>, vector<16x32xf32>, vector<2x32xf32> -> vector<2x32xf32>
    %11 = arith.addf %8, %10 : vector<2x32xf32>
    %cst_8 = arith.constant 0.000000e+00 : f32
    %12 = vector.broadcast %cst_8 : f32 to vector<2x32xf32>
    %13 = arith.maximumf %11, %12 : vector<2x32xf32>
    %c0_9 = arith.constant 0 : index
    %c0_10 = arith.constant 0 : index
    %14 = vector.load %arg5[%c0_9, %c0_10] : memref<1x32xf32, #tpu.memory_space<vmem>>, vector<1x32xf32>
    %15 = vector.broadcast %14 : vector<1x32xf32> to vector<2x32xf32>
    %16 = arith.mulf %13, %15 : vector<2x32xf32>
    %cst_11 = arith.constant dense<0.000000e+00> : vector<2xf32>
    %17 = vector.multi_reduction <add>, %16, %cst_11 [1] : vector<2x32xf32> to vector<2xf32>
    %c0_12 = arith.constant 0 : index
    %18 = memref.load %arg6[%c0_12] : memref<1xf32, #tpu.memory_space<smem>>
    %19 = vector.broadcast %18 : f32 to vector<2xf32>
    %20 = arith.addf %17, %19 : vector<2xf32>
    %c0_13 = arith.constant 0 : index
    %c0_14 = arith.constant 0 : index
    %c0_15 = arith.constant 0 : index
    %21 = vector.load %arg7[%c0_13, %c0_14, %c0_15] : memref<1x8x2xf32, #tpu.memory_space<vmem>>, vector<1x1x2xf32>
    %22 = vector.shape_cast %21 : vector<1x1x2xf32> to vector<2xf32>
    %23 = vector.shape_cast %20 : vector<2xf32> to vector<1x1x2xf32>
    tpu.vector_store %arg7[%c0_13, %c0_14, %c0_15], %23 {strides = array<i32>} : memref<1x8x2xf32, #tpu.memory_space<vmem>>, vector<1x1x2xf32>,
    %c2 = arith.constant 2 : index
    %c0_16 = arith.constant 0 : index
    %24 = vector.load %arg1[%c2, %c0_16] : memref<16x1xi32, #tpu.memory_space<vmem>>, vector<2x1xi32>
    %c2_17 = arith.constant 2 : index
    %c0_18 = arith.constant 0 : index
    %25 = vector.load %arg2[%c2_17, %c0_18] : memref<16x16xf32, #tpu.memory_space<vmem>>, vector<2x16xf32>
    %26 = tpu.iota {dimensions = array<i32: 1>} : vector<2x10xi32>
    %27 = vector.broadcast %24 : vector<2x1xi32> to vector<2x10xi32>
    %28 = arith.cmpi eq, %26, %27 : vector<2x10xi32>
    %29 = arith.extui %28 : vector<2x10xi1> to vector<2x10xi32>
    %30 = arith.sitofp %29 : vector<2x10xi32> to vector<2x10xf32>
    %c0_19 = arith.constant 0 : index
    %c0_20 = arith.constant 0 : index
    %31 = vector.load %arg3[%c0_19, %c0_20] : memref<10x32xf32, #tpu.memory_space<vmem>>, vector<10x32xf32>
    %cst_21 = arith.constant dense<0.000000e+00> : vector<2x32xf32>
    %32 = tpu.matmul %30, %31, %cst_21 {dimension_numbers = #tpu.dot_dimension_numbers<[1], [0], [0], [1], [0, 0, 1, 1], [], []>} : vector<2x10xf32>, vector<10x32xf32>, vector<2x32xf32> -> vector<2x32xf32>
    %c0_22 = arith.constant 0 : index
    %c0_23 = arith.constant 0 : index
    %33 = vector.load %arg4[%c0_22, %c0_23] : memref<16x32xf32, #tpu.memory_space<vmem>>, vector<16x32xf32>
    %cst_24 = arith.constant dense<0.000000e+00> : vector<2x32xf32>
    %34 = tpu.matmul %25, %33, %cst_24 {dimension_numbers = #tpu.dot_dimension_numbers<[1], [0], [0], [1], [0, 0, 1, 1], [], []>} : vector<2x16xf32>, vector<16x32xf32>, vector<2x32xf32> -> vector<2x32xf32>
    %35 = arith.addf %32, %34 : vector<2x32xf32>
    %cst_25 = arith.constant 0.000000e+00 : f32
    %36 = vector.broadcast %cst_25 : f32 to vector<2x32xf32>
    %37 = arith.maximumf %35, %36 : vector<2x32xf32>
    %c0_26 = arith.constant 0 : index
    %c0_27 = arith.constant 0 : index
    %38 = vector.load %arg5[%c0_26, %c0_27] : memref<1x32xf32, #tpu.memory_space<vmem>>, vector<1x32xf32>
    %39 = vector.broadcast %38 : vector<1x32xf32> to vector<2x32xf32>
    %40 = arith.mulf %37, %39 : vector<2x32xf32>
    %cst_28 = arith.constant dense<0.000000e+00> : vector<2xf32>
    %41 = vector.multi_reduction <add>, %40, %cst_28 [1] : vector<2x32xf32> to vector<2xf32>
    %c0_29 = arith.constant 0 : index
    %42 = memref.load %arg6[%c0_29] : memref<1xf32, #tpu.memory_space<smem>>
    %43 = vector.broadcast %42 : f32 to vector<2xf32>
    %44 = arith.addf %41, %43 : vector<2xf32>
    %c0_30 = arith.constant 0 : index
    %c1 = arith.constant 1 : index
    %c0_31 = arith.constant 0 : index
    %45 = vector.load %arg7[%c0_30, %c1, %c0_31] : memref<1x8x2xf32, #tpu.memory_space<vmem>>, vector<1x1x2xf32>
    %46 = vector.shape_cast %45 : vector<1x1x2xf32> to vector<2xf32>
    %47 = vector.shape_cast %44 : vector<2xf32> to vector<1x1x2xf32>
    tpu.vector_store %arg7[%c0_30, %c1, %c0_31], %47 {strides = array<i32>} : memref<1x8x2xf32, #tpu.memory_space<vmem>>, vector<1x1x2xf32>,
    %c4 = arith.constant 4 : index
    %c0_32 = arith.constant 0 : index
    %48 = vector.load %arg1[%c4, %c0_32] : memref<16x1xi32, #tpu.memory_space<vmem>>, vector<2x1xi32>
    %c4_33 = arith.constant 4 : index
    %c0_34 = arith.constant 0 : index
    %49 = vector.load %arg2[%c4_33, %c0_34] : memref<16x16xf32, #tpu.memory_space<vmem>>, vector<2x16xf32>
    %50 = tpu.iota {dimensions = array<i32: 1>} : vector<2x10xi32>
    %51 = vector.broadcast %48 : vector<2x1xi32> to vector<2x10xi32>
    %52 = arith.cmpi eq, %50, %51 : vector<2x10xi32>
    %53 = arith.extui %52 : vector<2x10xi1> to vector<2x10xi32>
    %54 = arith.sitofp %53 : vector<2x10xi32> to vector<2x10xf32>
    %c0_35 = arith.constant 0 : index
    %c0_36 = arith.constant 0 : index
    %55 = vector.load %arg3[%c0_35, %c0_36] : memref<10x32xf32, #tpu.memory_space<vmem>>, vector<10x32xf32>
    %cst_37 = arith.constant dense<0.000000e+00> : vector<2x32xf32>
    %56 = tpu.matmul %54, %55, %cst_37 {dimension_numbers = #tpu.dot_dimension_numbers<[1], [0], [0], [1], [0, 0, 1, 1], [], []>} : vector<2x10xf32>, vector<10x32xf32>, vector<2x32xf32> -> vector<2x32xf32>
    %c0_38 = arith.constant 0 : index
    %c0_39 = arith.constant 0 : index
    %57 = vector.load %arg4[%c0_38, %c0_39] : memref<16x32xf32, #tpu.memory_space<vmem>>, vector<16x32xf32>
    %cst_40 = arith.constant dense<0.000000e+00> : vector<2x32xf32>
    %58 = tpu.matmul %49, %57, %cst_40 {dimension_numbers = #tpu.dot_dimension_numbers<[1], [0], [0], [1], [0, 0, 1, 1], [], []>} : vector<2x16xf32>, vector<16x32xf32>, vector<2x32xf32> -> vector<2x32xf32>
    %59 = arith.addf %56, %58 : vector<2x32xf32>
    %cst_41 = arith.constant 0.000000e+00 : f32
    %60 = vector.broadcast %cst_41 : f32 to vector<2x32xf32>
    %61 = arith.maximumf %59, %60 : vector<2x32xf32>
    %c0_42 = arith.constant 0 : index
    %c0_43 = arith.constant 0 : index
    %62 = vector.load %arg5[%c0_42, %c0_43] : memref<1x32xf32, #tpu.memory_space<vmem>>, vector<1x32xf32>
    %63 = vector.broadcast %62 : vector<1x32xf32> to vector<2x32xf32>
    %64 = arith.mulf %61, %63 : vector<2x32xf32>
    %cst_44 = arith.constant dense<0.000000e+00> : vector<2xf32>
    %65 = vector.multi_reduction <add>, %64, %cst_44 [1] : vector<2x32xf32> to vector<2xf32>
    %c0_45 = arith.constant 0 : index
    %66 = memref.load %arg6[%c0_45] : memref<1xf32, #tpu.memory_space<smem>>
    %67 = vector.broadcast %66 : f32 to vector<2xf32>
    %68 = arith.addf %65, %67 : vector<2xf32>
    %c0_46 = arith.constant 0 : index
    %c2_47 = arith.constant 2 : index
    %c0_48 = arith.constant 0 : index
    %69 = vector.load %arg7[%c0_46, %c2_47, %c0_48] : memref<1x8x2xf32, #tpu.memory_space<vmem>>, vector<1x1x2xf32>
    %70 = vector.shape_cast %69 : vector<1x1x2xf32> to vector<2xf32>
    %71 = vector.shape_cast %68 : vector<2xf32> to vector<1x1x2xf32>
    tpu.vector_store %arg7[%c0_46, %c2_47, %c0_48], %71 {strides = array<i32>} : memref<1x8x2xf32, #tpu.memory_space<vmem>>, vector<1x1x2xf32>,
    %c6 = arith.constant 6 : index
    %c0_49 = arith.constant 0 : index
    %72 = vector.load %arg1[%c6, %c0_49] : memref<16x1xi32, #tpu.memory_space<vmem>>, vector<2x1xi32>
    %c6_50 = arith.constant 6 : index
    %c0_51 = arith.constant 0 : index
    %73 = vector.load %arg2[%c6_50, %c0_51] : memref<16x16xf32, #tpu.memory_space<vmem>>, vector<2x16xf32>
    %74 = tpu.iota {dimensions = array<i32: 1>} : vector<2x10xi32>
    %75 = vector.broadcast %72 : vector<2x1xi32> to vector<2x10xi32>
    %76 = arith.cmpi eq, %74, %75 : vector<2x10xi32>
    %77 = arith.extui %76 : vector<2x10xi1> to vector<2x10xi32>
    %78 = arith.sitofp %77 : vector<2x10xi32> to vector<2x10xf32>
    %c0_52 = arith.constant 0 : index
    %c0_53 = arith.constant 0 : index
    %79 = vector.load %arg3[%c0_52, %c0_53] : memref<10x32xf32, #tpu.memory_space<vmem>>, vector<10x32xf32>
    %cst_54 = arith.constant dense<0.000000e+00> : vector<2x32xf32>
    %80 = tpu.matmul %78, %79, %cst_54 {dimension_numbers = #tpu.dot_dimension_numbers<[1], [0], [0], [1], [0, 0, 1, 1], [], []>} : vector<2x10xf32>, vector<10x32xf32>, vector<2x32xf32> -> vector<2x32xf32>
    %c0_55 = arith.constant 0 : index
    %c0_56 = arith.constant 0 : index
    %81 = vector.load %arg4[%c0_55, %c0_56] : memref<16x32xf32, #tpu.memory_space<vmem>>, vector<16x32xf32>
    %cst_57 = arith.constant dense<0.000000e+00> : vector<2x32xf32>
    %82 = tpu.matmul %73, %81, %cst_57 {dimension_numbers = #tpu.dot_dimension_numbers<[1], [0], [0], [1], [0, 0, 1, 1], [], []>} : vector<2x16xf32>, vector<16x32xf32>, vector<2x32xf32> -> vector<2x32xf32>
    %83 = arith.addf %80, %82 : vector<2x32xf32>
    %cst_58 = arith.constant 0.000000e+00 : f32
    %84 = vector.broadcast %cst_58 : f32 to vector<2x32xf32>
    %85 = arith.maximumf %83, %84 : vector<2x32xf32>
    %c0_59 = arith.constant 0 : index
    %c0_60 = arith.constant 0 : index
    %86 = vector.load %arg5[%c0_59, %c0_60] : memref<1x32xf32, #tpu.memory_space<vmem>>, vector<1x32xf32>
    %87 = vector.broadcast %86 : vector<1x32xf32> to vector<2x32xf32>
    %88 = arith.mulf %85, %87 : vector<2x32xf32>
    %cst_61 = arith.constant dense<0.000000e+00> : vector<2xf32>
    %89 = vector.multi_reduction <add>, %88, %cst_61 [1] : vector<2x32xf32> to vector<2xf32>
    %c0_62 = arith.constant 0 : index
    %90 = memref.load %arg6[%c0_62] : memref<1xf32, #tpu.memory_space<smem>>
    %91 = vector.broadcast %90 : f32 to vector<2xf32>
    %92 = arith.addf %89, %91 : vector<2xf32>
    %c0_63 = arith.constant 0 : index
    %c3 = arith.constant 3 : index
    %c0_64 = arith.constant 0 : index
    %93 = vector.load %arg7[%c0_63, %c3, %c0_64] : memref<1x8x2xf32, #tpu.memory_space<vmem>>, vector<1x1x2xf32>
    %94 = vector.shape_cast %93 : vector<1x1x2xf32> to vector<2xf32>
    %95 = vector.shape_cast %92 : vector<2xf32> to vector<1x1x2xf32>
    tpu.vector_store %arg7[%c0_63, %c3, %c0_64], %95 {strides = array<i32>} : memref<1x8x2xf32, #tpu.memory_space<vmem>>, vector<1x1x2xf32>,
    %c8 = arith.constant 8 : index
    %c0_65 = arith.constant 0 : index
    %96 = vector.load %arg1[%c8, %c0_65] : memref<16x1xi32, #tpu.memory_space<vmem>>, vector<2x1xi32>
    %c8_66 = arith.constant 8 : index
    %c0_67 = arith.constant 0 : index
    %97 = vector.load %arg2[%c8_66, %c0_67] : memref<16x16xf32, #tpu.memory_space<vmem>>, vector<2x16xf32>
    %98 = tpu.iota {dimensions = array<i32: 1>} : vector<2x10xi32>
    %99 = vector.broadcast %96 : vector<2x1xi32> to vector<2x10xi32>
    %100 = arith.cmpi eq, %98, %99 : vector<2x10xi32>
    %101 = arith.extui %100 : vector<2x10xi1> to vector<2x10xi32>
    %102 = arith.sitofp %101 : vector<2x10xi32> to vector<2x10xf32>
    %c0_68 = arith.constant 0 : index
    %c0_69 = arith.constant 0 : index
    %103 = vector.load %arg3[%c0_68, %c0_69] : memref<10x32xf32, #tpu.memory_space<vmem>>, vector<10x32xf32>
    %cst_70 = arith.constant dense<0.000000e+00> : vector<2x32xf32>
    %104 = tpu.matmul %102, %103, %cst_70 {dimension_numbers = #tpu.dot_dimension_numbers<[1], [0], [0], [1], [0, 0, 1, 1], [], []>} : vector<2x10xf32>, vector<10x32xf32>, vector<2x32xf32> -> vector<2x32xf32>
    %c0_71 = arith.constant 0 : index
    %c0_72 = arith.constant 0 : index
    %105 = vector.load %arg4[%c0_71, %c0_72] : memref<16x32xf32, #tpu.memory_space<vmem>>, vector<16x32xf32>
    %cst_73 = arith.constant dense<0.000000e+00> : vector<2x32xf32>
    %106 = tpu.matmul %97, %105, %cst_73 {dimension_numbers = #tpu.dot_dimension_numbers<[1], [0], [0], [1], [0, 0, 1, 1], [], []>} : vector<2x16xf32>, vector<16x32xf32>, vector<2x32xf32> -> vector<2x32xf32>
    %107 = arith.addf %104, %106 : vector<2x32xf32>
    %cst_74 = arith.constant 0.000000e+00 : f32
    %108 = vector.broadcast %cst_74 : f32 to vector<2x32xf32>
    %109 = arith.maximumf %107, %108 : vector<2x32xf32>
    %c0_75 = arith.constant 0 : index
    %c0_76 = arith.constant 0 : index
    %110 = vector.load %arg5[%c0_75, %c0_76] : memref<1x32xf32, #tpu.memory_space<vmem>>, vector<1x32xf32>
    %111 = vector.broadcast %110 : vector<1x32xf32> to vector<2x32xf32>
    %112 = arith.mulf %109, %111 : vector<2x32xf32>
    %cst_77 = arith.constant dense<0.000000e+00> : vector<2xf32>
    %113 = vector.multi_reduction <add>, %112, %cst_77 [1] : vector<2x32xf32> to vector<2xf32>
    %c0_78 = arith.constant 0 : index
    %114 = memref.load %arg6[%c0_78] : memref<1xf32, #tpu.memory_space<smem>>
    %115 = vector.broadcast %114 : f32 to vector<2xf32>
    %116 = arith.addf %113, %115 : vector<2xf32>
    %c0_79 = arith.constant 0 : index
    %c4_80 = arith.constant 4 : index
    %c0_81 = arith.constant 0 : index
    %117 = vector.load %arg7[%c0_79, %c4_80, %c0_81] : memref<1x8x2xf32, #tpu.memory_space<vmem>>, vector<1x1x2xf32>
    %118 = vector.shape_cast %117 : vector<1x1x2xf32> to vector<2xf32>
    %119 = vector.shape_cast %116 : vector<2xf32> to vector<1x1x2xf32>
    tpu.vector_store %arg7[%c0_79, %c4_80, %c0_81], %119 {strides = array<i32>} : memref<1x8x2xf32, #tpu.memory_space<vmem>>, vector<1x1x2xf32>,
    %c10 = arith.constant 10 : index
    %c0_82 = arith.constant 0 : index
    %120 = vector.load %arg1[%c10, %c0_82] : memref<16x1xi32, #tpu.memory_space<vmem>>, vector<2x1xi32>
    %c10_83 = arith.constant 10 : index
    %c0_84 = arith.constant 0 : index
    %121 = vector.load %arg2[%c10_83, %c0_84] : memref<16x16xf32, #tpu.memory_space<vmem>>, vector<2x16xf32>
    %122 = tpu.iota {dimensions = array<i32: 1>} : vector<2x10xi32>
    %123 = vector.broadcast %120 : vector<2x1xi32> to vector<2x10xi32>
    %124 = arith.cmpi eq, %122, %123 : vector<2x10xi32>
    %125 = arith.extui %124 : vector<2x10xi1> to vector<2x10xi32>
    %126 = arith.sitofp %125 : vector<2x10xi32> to vector<2x10xf32>
    %c0_85 = arith.constant 0 : index
    %c0_86 = arith.constant 0 : index
    %127 = vector.load %arg3[%c0_85, %c0_86] : memref<10x32xf32, #tpu.memory_space<vmem>>, vector<10x32xf32>
    %cst_87 = arith.constant dense<0.000000e+00> : vector<2x32xf32>
    %128 = tpu.matmul %126, %127, %cst_87 {dimension_numbers = #tpu.dot_dimension_numbers<[1], [0], [0], [1], [0, 0, 1, 1], [], []>} : vector<2x10xf32>, vector<10x32xf32>, vector<2x32xf32> -> vector<2x32xf32>
    %c0_88 = arith.constant 0 : index
    %c0_89 = arith.constant 0 : index
    %129 = vector.load %arg4[%c0_88, %c0_89] : memref<16x32xf32, #tpu.memory_space<vmem>>, vector<16x32xf32>
    %cst_90 = arith.constant dense<0.000000e+00> : vector<2x32xf32>
    %130 = tpu.matmul %121, %129, %cst_90 {dimension_numbers = #tpu.dot_dimension_numbers<[1], [0], [0], [1], [0, 0, 1, 1], [], []>} : vector<2x16xf32>, vector<16x32xf32>, vector<2x32xf32> -> vector<2x32xf32>
    %131 = arith.addf %128, %130 : vector<2x32xf32>
    %cst_91 = arith.constant 0.000000e+00 : f32
    %132 = vector.broadcast %cst_91 : f32 to vector<2x32xf32>
    %133 = arith.maximumf %131, %132 : vector<2x32xf32>
    %c0_92 = arith.constant 0 : index
    %c0_93 = arith.constant 0 : index
    %134 = vector.load %arg5[%c0_92, %c0_93] : memref<1x32xf32, #tpu.memory_space<vmem>>, vector<1x32xf32>
    %135 = vector.broadcast %134 : vector<1x32xf32> to vector<2x32xf32>
    %136 = arith.mulf %133, %135 : vector<2x32xf32>
    %cst_94 = arith.constant dense<0.000000e+00> : vector<2xf32>
    %137 = vector.multi_reduction <add>, %136, %cst_94 [1] : vector<2x32xf32> to vector<2xf32>
    %c0_95 = arith.constant 0 : index
    %138 = memref.load %arg6[%c0_95] : memref<1xf32, #tpu.memory_space<smem>>
    %139 = vector.broadcast %138 : f32 to vector<2xf32>
    %140 = arith.addf %137, %139 : vector<2xf32>
    %c0_96 = arith.constant 0 : index
    %c5 = arith.constant 5 : index
    %c0_97 = arith.constant 0 : index
    %141 = vector.load %arg7[%c0_96, %c5, %c0_97] : memref<1x8x2xf32, #tpu.memory_space<vmem>>, vector<1x1x2xf32>
    %142 = vector.shape_cast %141 : vector<1x1x2xf32> to vector<2xf32>
    %143 = vector.shape_cast %140 : vector<2xf32> to vector<1x1x2xf32>
    tpu.vector_store %arg7[%c0_96, %c5, %c0_97], %143 {strides = array<i32>} : memref<1x8x2xf32, #tpu.memory_space<vmem>>, vector<1x1x2xf32>,
    %c12 = arith.constant 12 : index
    %c0_98 = arith.constant 0 : index
    %144 = vector.load %arg1[%c12, %c0_98] : memref<16x1xi32, #tpu.memory_space<vmem>>, vector<2x1xi32>
    %c12_99 = arith.constant 12 : index
    %c0_100 = arith.constant 0 : index
    %145 = vector.load %arg2[%c12_99, %c0_100] : memref<16x16xf32, #tpu.memory_space<vmem>>, vector<2x16xf32>
    %146 = tpu.iota {dimensions = array<i32: 1>} : vector<2x10xi32>
    %147 = vector.broadcast %144 : vector<2x1xi32> to vector<2x10xi32>
    %148 = arith.cmpi eq, %146, %147 : vector<2x10xi32>
    %149 = arith.extui %148 : vector<2x10xi1> to vector<2x10xi32>
    %150 = arith.sitofp %149 : vector<2x10xi32> to vector<2x10xf32>
    %c0_101 = arith.constant 0 : index
    %c0_102 = arith.constant 0 : index
    %151 = vector.load %arg3[%c0_101, %c0_102] : memref<10x32xf32, #tpu.memory_space<vmem>>, vector<10x32xf32>
    %cst_103 = arith.constant dense<0.000000e+00> : vector<2x32xf32>
    %152 = tpu.matmul %150, %151, %cst_103 {dimension_numbers = #tpu.dot_dimension_numbers<[1], [0], [0], [1], [0, 0, 1, 1], [], []>} : vector<2x10xf32>, vector<10x32xf32>, vector<2x32xf32> -> vector<2x32xf32>
    %c0_104 = arith.constant 0 : index
    %c0_105 = arith.constant 0 : index
    %153 = vector.load %arg4[%c0_104, %c0_105] : memref<16x32xf32, #tpu.memory_space<vmem>>, vector<16x32xf32>
    %cst_106 = arith.constant dense<0.000000e+00> : vector<2x32xf32>
    %154 = tpu.matmul %145, %153, %cst_106 {dimension_numbers = #tpu.dot_dimension_numbers<[1], [0], [0], [1], [0, 0, 1, 1], [], []>} : vector<2x16xf32>, vector<16x32xf32>, vector<2x32xf32> -> vector<2x32xf32>
    %155 = arith.addf %152, %154 : vector<2x32xf32>
    %cst_107 = arith.constant 0.000000e+00 : f32
    %156 = vector.broadcast %cst_107 : f32 to vector<2x32xf32>
    %157 = arith.maximumf %155, %156 : vector<2x32xf32>
    %c0_108 = arith.constant 0 : index
    %c0_109 = arith.constant 0 : index
    %158 = vector.load %arg5[%c0_108, %c0_109] : memref<1x32xf32, #tpu.memory_space<vmem>>, vector<1x32xf32>
    %159 = vector.broadcast %158 : vector<1x32xf32> to vector<2x32xf32>
    %160 = arith.mulf %157, %159 : vector<2x32xf32>
    %cst_110 = arith.constant dense<0.000000e+00> : vector<2xf32>
    %161 = vector.multi_reduction <add>, %160, %cst_110 [1] : vector<2x32xf32> to vector<2xf32>
    %c0_111 = arith.constant 0 : index
    %162 = memref.load %arg6[%c0_111] : memref<1xf32, #tpu.memory_space<smem>>
    %163 = vector.broadcast %162 : f32 to vector<2xf32>
    %164 = arith.addf %161, %163 : vector<2xf32>
    %c0_112 = arith.constant 0 : index
    %c6_113 = arith.constant 6 : index
    %c0_114 = arith.constant 0 : index
    %165 = vector.load %arg7[%c0_112, %c6_113, %c0_114] : memref<1x8x2xf32, #tpu.memory_space<vmem>>, vector<1x1x2xf32>
    %166 = vector.shape_cast %165 : vector<1x1x2xf32> to vector<2xf32>
    %167 = vector.shape_cast %164 : vector<2xf32> to vector<1x1x2xf32>
    tpu.vector_store %arg7[%c0_112, %c6_113, %c0_114], %167 {strides = array<i32>} : memref<1x8x2xf32, #tpu.memory_space<vmem>>, vector<1x1x2xf32>,
    %c14 = arith.constant 14 : index
    %c0_115 = arith.constant 0 : index
    %168 = vector.load %arg1[%c14, %c0_115] : memref<16x1xi32, #tpu.memory_space<vmem>>, vector<2x1xi32>
    %c14_116 = arith.constant 14 : index
    %c0_117 = arith.constant 0 : index
    %169 = vector.load %arg2[%c14_116, %c0_117] : memref<16x16xf32, #tpu.memory_space<vmem>>, vector<2x16xf32>
    %170 = tpu.iota {dimensions = array<i32: 1>} : vector<2x10xi32>
    %171 = vector.broadcast %168 : vector<2x1xi32> to vector<2x10xi32>
    %172 = arith.cmpi eq, %170, %171 : vector<2x10xi32>
    %173 = arith.extui %172 : vector<2x10xi1> to vector<2x10xi32>
    %174 = arith.sitofp %173 : vector<2x10xi32> to vector<2x10xf32>
    %c0_118 = arith.constant 0 : index
    %c0_119 = arith.constant 0 : index
    %175 = vector.load %arg3[%c0_118, %c0_119] : memref<10x32xf32, #tpu.memory_space<vmem>>, vector<10x32xf32>
    %cst_120 = arith.constant dense<0.000000e+00> : vector<2x32xf32>
    %176 = tpu.matmul %174, %175, %cst_120 {dimension_numbers = #tpu.dot_dimension_numbers<[1], [0], [0], [1], [0, 0, 1, 1], [], []>} : vector<2x10xf32>, vector<10x32xf32>, vector<2x32xf32> -> vector<2x32xf32>
    %c0_121 = arith.constant 0 : index
    %c0_122 = arith.constant 0 : index
    %177 = vector.load %arg4[%c0_121, %c0_122] : memref<16x32xf32, #tpu.memory_space<vmem>>, vector<16x32xf32>
    %cst_123 = arith.constant dense<0.000000e+00> : vector<2x32xf32>
    %178 = tpu.matmul %169, %177, %cst_123 {dimension_numbers = #tpu.dot_dimension_numbers<[1], [0], [0], [1], [0, 0, 1, 1], [], []>} : vector<2x16xf32>, vector<16x32xf32>, vector<2x32xf32> -> vector<2x32xf32>
    %179 = arith.addf %176, %178 : vector<2x32xf32>
    %cst_124 = arith.constant 0.000000e+00 : f32
    %180 = vector.broadcast %cst_124 : f32 to vector<2x32xf32>
    %181 = arith.maximumf %179, %180 : vector<2x32xf32>
    %c0_125 = arith.constant 0 : index
    %c0_126 = arith.constant 0 : index
    %182 = vector.load %arg5[%c0_125, %c0_126] : memref<1x32xf32, #tpu.memory_space<vmem>>, vector<1x32xf32>
    %183 = vector.broadcast %182 : vector<1x32xf32> to vector<2x32xf32>
    %184 = arith.mulf %181, %183 : vector<2x32xf32>
    %cst_127 = arith.constant dense<0.000000e+00> : vector<2xf32>
    %185 = vector.multi_reduction <add>, %184, %cst_127 [1] : vector<2x32xf32> to vector<2xf32>
    %c0_128 = arith.constant 0 : index
    %186 = memref.load %arg6[%c0_128] : memref<1xf32, #tpu.memory_space<smem>>
    %187 = vector.broadcast %186 : f32 to vector<2xf32>
    %188 = arith.addf %185, %187 : vector<2xf32>
    %c0_129 = arith.constant 0 : index
    %c7 = arith.constant 7 : index
    %c0_130 = arith.constant 0 : index
    %189 = vector.load %arg7[%c0_129, %c7, %c0_130] : memref<1x8x2xf32, #tpu.memory_space<vmem>>, vector<1x1x2xf32>
    %190 = vector.shape_cast %189 : vector<1x1x2xf32> to vector<2xf32>
    %191 = vector.shape_cast %188 : vector<2xf32> to vector<1x1x2xf32>
    tpu.vector_store %arg7[%c0_129, %c7, %c0_130], %191 {strides = array<i32>} : memref<1x8x2xf32, #tpu.memory_space<vmem>>, vector<1x1x2xf32>,
    return
  }
  func.func @transform_0(%arg0: i32) -> (i32, i32) {
    %c0_i32 = arith.constant 0 : i32
    %c0_i32_0 = arith.constant 0 : i32
    return %arg0, %c0_i32 : i32, i32
  }
  func.func @transform_1(%arg0: i32) -> (i32, i32) {
    %c0_i32 = arith.constant 0 : i32
    %c0_i32_0 = arith.constant 0 : i32
    return %arg0, %c0_i32 : i32, i32
  }
  func.func @transform_2(%arg0: i32) -> (i32, i32) {
    %c0_i32 = arith.constant 0 : i32
    %c0_i32_0 = arith.constant 0 : i32
    %c0_i32_1 = arith.constant 0 : i32
    return %c0_i32, %c0_i32_0 : i32, i32
  }
  func.func @transform_3(%arg0: i32) -> (i32, i32) {
    %c0_i32 = arith.constant 0 : i32
    %c0_i32_0 = arith.constant 0 : i32
    %c0_i32_1 = arith.constant 0 : i32
    return %c0_i32, %c0_i32_0 : i32, i32
  }
  func.func @transform_4(%arg0: i32) -> (i32, i32) {
    %c0_i32 = arith.constant 0 : i32
    %c0_i32_0 = arith.constant 0 : i32
    %c0_i32_1 = arith.constant 0 : i32
    return %c0_i32, %c0_i32_0 : i32, i32
  }
  func.func @transform_5(%arg0: i32) -> i32 {
    %c0_i32 = arith.constant 0 : i32
    %c0_i32_0 = arith.constant 0 : i32
    return %c0_i32 : i32
  }
  func.func @transform_6(%arg0: i32) -> (i32, i32, i32) {
    %c0_i32 = arith.constant 0 : i32
    %c0_i32_0 = arith.constant 0 : i32
    %c0_i32_1 = arith.constant 0 : i32
    return %arg0, %c0_i32, %c0_i32_0 : i32, i32, i32
  }
}

</mosaic_0001>

<bundles_post_ra>
// kernel: _fused_forward.1
= control target key start
LH: loop header
LB: loop body
LE: loop exit
PB: predicated region body
PF: predicated region fallthrough
CT: control target
= control target key end

     0   :  { %s2125_s23 = smov 0   ;;  %s2361_s0 = inlined_call_operand.vmem [shape: s32[20,1], index: 0, kind: input, shape index: {}]   ;;  %s2362_s1 = inlined_call_operand.vmem [shape: f32[20,16], index: 1, kind: input, shape index: {}]   ;;  %s2363_s2 = inlined_call_operand.vmem [shape: f32[10,32], index: 2, kind: input, shape index: {}]   ;;  %s2364_s3 = inlined_call_operand.vmem [shape: f32[16,32], index: 3, kind: input, shape index: {}]   ;;  %s2365_s4 = inlined_call_operand.vmem [shape: f32[1,32], index: 4, kind: input, shape index: {}]   ;;  %s2366_s5 = inlined_call_operand.<no memory space> [shape: f32[1], index: 5, kind: input, shape index: {}]   ;;  %s2367_s6 = inlined_call_operand.vmem [shape: f32[2,8,2], index: 6, kind: output, shape index: {}]  }
   0x1   :  { %11 = sst [smem:[#allocation2]] %s2366_s5 }
   0x2 LB: > { %s2131_s24 = sadd.s32 4294967295, %s2082_s23   ;;  %p1855_p0 = scmp.ge.s32.totalorder %s2082_s23, 1  ;;  %s2082_s23 = sphi %s2125_s23, %s17_s23  }
   0x3   : > { %p241_p1 = scmp.lt.s32.totalorder %s2082_s23, 3 }
   0x5   : > { %p242_p2 = pnand %p1855_p0, %p241_p1 }
   0x6   : > { %s1856_s25 = sshll.u32 (!%p242_p2), %s2131_s24, 1  ;;  %p311_p4 = scmp.lt.s32.totalorder (!%p242_p2), %s2131_s24, 1 }
   0x7   : > { %245 = sbr.rel (%p242_p2) target bundleno = 517 (0x205), region = 44  ;;  %p288_p3 = scmp.lt.s32.totalorder (!%p242_p2), %s1856_s25, 2 }
   0xc   : > { %v2139_v0 = vld [vmem:[%s2364_s3 + $0x8] sm:$0xff]  ;;  %v2084_v2 = vmov 0   ;;  %vm407_vm0 = vcmask 1041408   ;;  %v2085_v3 = vmov 0.0   ;;  %v2149_v4 = vld [vmem:[%s2364_s3] sm:$0xff]  ;;  %s2369_s25 = smov (!%p288_p3, %s1856_s25), 2  ;;  %v317_v22 = vlaneseq }
   0xd   : > { %v326_v1 = vld [vmem:[%s2363_s2 + $0x8] sm:$0x3]  ;;  %2075 = vset.pattern.permute.xlu1 %v2084_v2  ;;  %2074 = vset.pattern.permute.xlu0 %v2084_v2  ;;  %vm2086_vm1 = vmmov 0   ;;  %v2159_v5 = vld [vmem:[%s2363_s2] sm:$0xff]  ;;  %s1857_s9 = sshll.u32 %s2369_s25, 3  ;;  %vm329_vm2 = vcmask 130048  }
   0xe   : > { %1951 = vmatprep.subr.mxu0 %v2085_v3  ;;  %1958 = vmatprep.subr.mxu1 %v2085_v3  ;;  %s291_s12 = scalar_lea.vmem %s2361_s0, %s1857_s9  ;;  %s2169_s15 = scalar_lea.vmem %s2362_s1, %s1857_s9  ;;  %v2234_v23 = vand.u32 127, %v317_v22  ;;  %vm403_vm3 = vcmask 80896   ;;  %v514_v25 = vld [vmem:[%s2363_s2 + $0x8] sm:$0x3]  ;;  %v1865_v2 = vld [vmem:[%s2365_s4] ss:$0 sm:$0xff] }
   0xf   : > { %1952 = vmatpush3.msra.mxu0 %v2139_v0  ;;  %1959 = vmatpush3.msk.msra.mxu1 %vm407_vm0, %v326_v1  ;;  %v688_v6 = vld [vmem:[%s291_s12 + $0x4] sm:$0x3]  ;;  %v315_v7 = vld [vmem:[%s291_s12] sm:$0x3]  ;;  %v871_v8 = vld [vmem:[%s291_s12 + $0x6] sm:$0x3] }
  0x10   : > { %1953 = vmatprep.subr.mxu0 %v2085_v3  ;;  %1955 = vmatprep.mubr.msk.f32.mxu0 %vm2086_vm1, %v2085_v3  ;;  %v505_v9 = vld [vmem:[%s291_s12 + $0x2] sm:$0x3]  ;;  %v316_v10 = vld [vmem:[%s2169_s15] sm:$0x3]  ;;  %v1237_v12 = vld [vmem:[%s291_s12 + $0xa] sm:$0x3] }
  0x11   : > { %1954 = vmatpush3.msra.mxu0 %v2149_v4  ;;  %1960 = vmatprep.subr.mxu1 %v2085_v3  ;;  %v506_v11 = vld [vmem:[%s2169_s15 + $0x2] sm:$0x3]  ;;  %v1054_v13 = vld [vmem:[%s291_s12 + $0x8] sm:$0x3]  ;;  %v1603_v14 = vld [vmem:[%s291_s12 + $0xe] sm:$0x3] }
  0x12   : > { %1961 = vmatpush3.msra.mxu1 %v2159_v5  ;;  %1965 = vmatprep.subr.mxu0 %v2085_v3  ;;  %v1420_v15 = vld [vmem:[%s291_s12 + $0xc] sm:$0x3]  ;;  %v689_v16 = vld [vmem:[%s2169_s15 + $0x4] sm:$0x3]  ;;  %v872_v17 = vld [vmem:[%s2169_s15 + $0x6] sm:$0x3] }
  0x13   : > { %1962 = vmatprep.mubr.msk.f32.mxu1 %vm2086_vm1, %v2085_v3  ;;  %1972 = vmatprep.subr.mxu1 %v2085_v3  ;;  %v1055_v18 = vld [vmem:[%s2169_s15 + $0x8] sm:$0x3]  ;;  %v1238_v19 = vld [vmem:[%s2169_s15 + $0xa] sm:$0x3]  ;;  %v1421_v20 = vld [vmem:[%s2169_s15 + $0xc] sm:$0x3] }
  0x14   : > { %691 = vperm.xlu1 %2075, %v688_v6   ;;  %320 = vperm.xlu0 %2074, %v315_v7   ;;  %v1604_v21 = vld [vmem:[%s2169_s15 + $0xe] sm:$0x3]  ;;  %v697_v29 = vld [vmem:[%s2363_s2 + $0x8] sm:$0x3]  ;;  %vm490_vm12 = vcmask 254976   ;;  %s494_s9 = sld [smem:[#allocation2]] }
  0x15   : > { %1956 = vmatmul.mubr.msk.f32.vlgmr.msra.gmra.mxu0 %vm329_vm2, %v316_v10  ;;  %v880_v32 = vld [vmem:[%s2363_s2 + $0x8] sm:$0x3]  ;;  %s2371_s24 = smov (!%p311_p4, %s2131_s24), 1  ;;  %vm503_vm13 = vcmask 8192  }
  0x16   : > { %1966 = vmatpush3.msra.mxu0 %v2139_v0  ;;  %1969 = vmatprep.mubr.msk.f32.mxu0 %vm2086_vm1, %v2085_v3  ;;  %v1063_v35 = vld [vmem:[%s2363_s2 + $0x8] sm:$0x3]  ;;  %s1860_s10 = sshll.u32 %s2371_s24, 3 }
  0x17   : > { %1967 = vmatprep.subr.mxu0 %v2085_v3  ;;  %v1246_v38 = vld [vmem:[%s2363_s2 + $0x8] sm:$0x3]  ;;  %s2340_s13 = scalar_lea.vmem %s2367_s6, %s1860_s10 }
  0x18   : > { %874 = vperm.xlu1 %2075, %v871_v8   ;;  %508 = vperm.xlu0 %2074, %v505_v9   ;;  %v1429_v41 = vld [vmem:[%s2363_s2 + $0x8] sm:$0x3] }
  0x19   : > { %1968 = vmatpush3.msra.mxu0 %v2149_v4  ;;  %v1612_v44 = vld [vmem:[%s2363_s2 + $0x8] sm:$0x3] }
  0x1a   : > { %1970 = vmatmul.mubr.msk.f32.vlgmr.msra.gmra.mxu0 %vm329_vm2, %v506_v11  ;;  %1979 = vmatprep.subr.mxu0 %v2085_v3 }
  0x1b   : > { %1980 = vmatpush3.msra.mxu0 %v2139_v0  ;;  %1983 = vmatprep.mubr.msk.f32.mxu0 %vm2086_vm1, %v2085_v3 }
  0x1c   : > { %1240 = vperm.xlu1 %2075, %v1237_v12   ;;  %1057 = vperm.xlu0 %2074, %v1054_v13  }
  0x1d   : > { %1981 = vmatprep.subr.mxu0 %v2085_v3 }
  0x1e   : > { %1982 = vmatpush3.msra.mxu0 %v2149_v4 }
  0x1f   : > { %1984 = vmatmul.mubr.msk.f32.vlgmr.msra.gmra.mxu0 %vm329_vm2, %v689_v16  ;;  %1993 = vmatprep.subr.mxu0 %v2085_v3 }
  0x20   : > { %1606 = vperm.xlu1 %2075, %v1603_v14   ;;  %1423 = vperm.xlu0 %2074, %v1420_v15  }
  0x21   : > { %1994 = vmatpush3.msra.mxu0 %v2139_v0  ;;  %1997 = vmatprep.mubr.msk.f32.mxu0 %vm2086_vm1, %v2085_v3 }
  0x22   : > { %1995 = vmatprep.subr.mxu0 %v2085_v3 }
  0x23   : > { %1996 = vmatpush3.msra.mxu0 %v2149_v4 }
  0x24   : > { %1998 = vmatmul.mubr.msk.f32.vlgmr.msra.gmra.mxu0 %vm329_vm2, %v872_v17  ;;  %2007 = vmatprep.subr.mxu0 %v2085_v3 }
  0x25   : > { %2008 = vmatpush3.msra.mxu0 %v2139_v0  ;;  %2011 = vmatprep.mubr.msk.f32.mxu0 %vm2086_vm1, %v2085_v3 }
  0x26   : > { %2009 = vmatprep.subr.mxu0 %v2085_v3 }
  0x27   : > { %2010 = vmatpush3.msra.mxu0 %v2149_v4 }
  0x28   : > { %2012 = vmatmul.mubr.msk.f32.vlgmr.msra.gmra.mxu0 %vm329_vm2, %v1055_v18  ;;  %2021 = vmatprep.subr.mxu0 %v2085_v3 }
  0x29   : > { %2022 = vmatpush3.msra.mxu0 %v2139_v0  ;;  %2025 = vmatprep.mubr.msk.f32.mxu0 %vm2086_vm1, %v2085_v3 }
  0x2a   : > { %2023 = vmatprep.subr.mxu0 %v2085_v3 }
  0x2b   : > { %2024 = vmatpush3.msra.mxu0 %v2149_v4 }
  0x2c   : > { %2026 = vmatmul.mubr.msk.f32.vlgmr.msra.gmra.mxu0 %vm329_vm2, %v1238_v19  ;;  %2035 = vmatprep.subr.mxu0 %v2085_v3 }
  0x2d   : > { %2036 = vmatpush3.msra.mxu0 %v2139_v0  ;;  %2039 = vmatprep.mubr.msk.f32.mxu0 %vm2086_vm1, %v2085_v3 }
  0x2e   : > { %2037 = vmatprep.subr.mxu0 %v2085_v3 }
  0x2f   : > { %2038 = vmatpush3.msra.mxu0 %v2149_v4 }
  0x30   : > { %2040 = vmatmul.mubr.msk.f32.vlgmr.msra.gmra.mxu0 %vm329_vm2, %v1421_v20  ;;  %2049 = vmatprep.subr.mxu0 %v2085_v3 }
  0x31   : > { %2050 = vmatpush3.msra.mxu0 %v2139_v0  ;;  %2053 = vmatprep.mubr.msk.f32.mxu0 %vm2086_vm1, %v2085_v3 }
  0x32   : > { %2051 = vmatprep.subr.mxu0 %v2085_v3 }
  0x33   : > { %2052 = vmatpush3.msra.mxu0 %v2149_v4 }
  0x34   : > { %2054 = vmatmul.mubr.msk.f32.vlgmr.msra.gmra.mxu0 %vm329_vm2, %v1604_v21 }
  0x8f   : > { %v321_v24 = vpop.permute.xlu0 %320  ;;  %v692_v27 = vpop.permute.xlu1 %691 }
  0x90   : > { %vm322_vm4 = vcmp.eq.s32.totalorder %v2234_v23, %v321_v24  ;;  %vm693_vm5 = vcmp.eq.s32.totalorder %v2234_v23, %v692_v27 }
  0x91   : > { %v1861_v26 = vsel %vm322_vm4, 1.0, %v2085_v3  ;;  %v1871_v31 = vsel %vm693_vm5, 1.0, %v2085_v3 }
  0x92   : > { %1963 = vmatmul.mubr.msk.f32.vlgmr.msra.gmra.mxu1 %vm403_vm3, %v1861_v26 }
  0x93   : > { %1973 = vmatpush3.msk.msra.mxu1 %vm407_vm0, %v514_v25  ;;  %v509_v28 = vpop.permute.xlu0 %508  ;;  %1976 = vmatprep.mubr.msk.f32.mxu1 %vm2086_vm1, %v2085_v3  ;;  %v875_v33 = vpop.permute.xlu1 %874 }
  0x94   : > { %1974 = vmatprep.subr.mxu1 %v2085_v3  ;;  %vm510_vm6 = vcmp.eq.s32.totalorder %v2234_v23, %v509_v28  ;;  %vm876_vm7 = vcmp.eq.s32.totalorder %v2234_v23, %v875_v33 }
  0x95   : > { %v1866_v30 = vsel %vm510_vm6, 1.0, %v2085_v3  ;;  %1975 = vmatpush3.msra.mxu1 %v2159_v5  ;;  %v1876_v36 = vsel %vm876_vm7, 1.0, %v2085_v3 }
  0x96   : > { %1986 = vmatprep.subr.mxu1 %v2085_v3  ;;  %1977 = vmatmul.mubr.msk.f32.vlgmr.msra.gmra.mxu1 %vm403_vm3, %v1866_v30 }
  0x97   : > { %1987 = vmatpush3.msk.msra.mxu1 %vm407_vm0, %v697_v29  ;;  %1990 = vmatprep.mubr.msk.f32.mxu1 %vm2086_vm1, %v2085_v3  ;;  %v1058_v34 = vpop.permute.xlu0 %1057  ;;  %v1241_v37 = vpop.permute.xlu1 %1240 }
  0x98   : > { %1988 = vmatprep.subr.mxu1 %v2085_v3  ;;  %vm1059_vm8 = vcmp.eq.s32.totalorder %v2234_v23, %v1058_v34  ;;  %vm1242_vm9 = vcmp.eq.s32.totalorder %v2234_v23, %v1241_v37 }
  0x99   : > { %1989 = vmatpush3.msra.mxu1 %v2159_v5  ;;  %v1881_v39 = vsel %vm1059_vm8, 1.0, %v2085_v3  ;;  %v1886_v42 = vsel %vm1242_vm9, 1.0, %v2085_v3 }
  0x9a   : > { %2000 = vmatprep.subr.mxu1 %v2085_v3  ;;  %1991 = vmatmul.mubr.msk.f32.vlgmr.msra.gmra.mxu1 %vm403_vm3, %v1871_v31 }
  0x9b   : > { %2001 = vmatpush3.msk.msra.mxu1 %vm407_vm0, %v880_v32  ;;  %2004 = vmatprep.mubr.msk.f32.mxu1 %vm2086_vm1, %v2085_v3  ;;  %v1424_v40 = vpop.permute.xlu0 %1423  ;;  %v1607_v43 = vpop.permute.xlu1 %1606 }
  0x9c   : > { %2002 = vmatprep.subr.mxu1 %v2085_v3  ;;  %vm1425_vm10 = vcmp.eq.s32.totalorder %v2234_v23, %v1424_v40  ;;  %vm1608_vm11 = vcmp.eq.s32.totalorder %v2234_v23, %v1607_v43 }
  0x9d   : > { %2003 = vmatpush3.msra.mxu1 %v2159_v5  ;;  %v1891_v45 = vsel %vm1425_vm10, 1.0, %v2085_v3  ;;  %v1896_v46 = vsel %vm1608_vm11, 1.0, %v2085_v3 }
  0x9e   : > { %2014 = vmatprep.subr.mxu1 %v2085_v3  ;;  %2005 = vmatmul.mubr.msk.f32.vlgmr.msra.gmra.mxu1 %vm403_vm3, %v1876_v36 }
  0x9f   : > { %2015 = vmatpush3.msk.msra.mxu1 %vm407_vm0, %v1063_v35  ;;  %2018 = vmatprep.mubr.msk.f32.mxu1 %vm2086_vm1, %v2085_v3 }
  0xa0   : > { %2016 = vmatprep.subr.mxu1 %v2085_v3 }
  0xa1   : > { %2017 = vmatpush3.msra.mxu1 %v2159_v5 }
  0xa2   : > { %2028 = vmatprep.subr.mxu1 %v2085_v3  ;;  %2019 = vmatmul.mubr.msk.f32.vlgmr.msra.gmra.mxu1 %vm403_vm3, %v1881_v39 }
  0xa3   : > { %2029 = vmatpush3.msk.msra.mxu1 %vm407_vm0, %v1246_v38  ;;  %2032 = vmatprep.mubr.msk.f32.mxu1 %vm2086_vm1, %v2085_v3 }
  0xa4   : > { %2030 = vmatprep.subr.mxu1 %v2085_v3 }
  0xa5   : > { %2031 = vmatpush3.msra.mxu1 %v2159_v5 }
  0xa6   : > { %2042 = vmatprep.subr.mxu1 %v2085_v3  ;;  %2033 = vmatmul.mubr.msk.f32.vlgmr.msra.gmra.mxu1 %vm403_vm3, %v1886_v42 }
  0xa7   : > { %2043 = vmatpush3.msk.msra.mxu1 %vm407_vm0, %v1429_v41  ;;  %2046 = vmatprep.mubr.msk.f32.mxu1 %vm2086_vm1, %v2085_v3 }
  0xa8   : > { %2044 = vmatprep.subr.mxu1 %v2085_v3 }
  0xa9   : > { %2045 = vmatpush3.msra.mxu1 %v2159_v5 }
  0xaa   : > { %2056 = vmatprep.subr.mxu1 %v2085_v3  ;;  %2047 = vmatmul.mubr.msk.f32.vlgmr.msra.gmra.mxu1 %vm403_vm3, %v1891_v45 }
  0xab   : > { %2057 = vmatpush3.msk.msra.mxu1 %vm407_vm0, %v1612_v44  ;;  %2060 = vmatprep.mubr.msk.f32.mxu1 %vm2086_vm1, %v2085_v3 }
  0xac   : > { %2058 = vmatprep.subr.mxu1 %v2085_v3 }
  0xad   : > { %2059 = vmatpush3.msra.mxu1 %v2159_v5 }
  0xae   : > { %2061 = vmatmul.mubr.msk.f32.vlgmr.msra.gmra.mxu1 %vm403_vm3, %v1896_v46 }
  0xd5   : > { %v399_v47 = vpop.f32.mrf.mxu0 }
  0xd7   : > { %v1957_v48 = vpop.f32.mrf.mxu0 }
  0xda   : > { %v586_v49 = vpop.f32.mrf.mxu0 }
  0xdc   : > { %v1971_v50 = vpop.f32.mrf.mxu0 }
  0xdd   : > { %v499_v50 = vshrl.u32 %v317_v22, 7 }
  0xdf   : > { %v769_v51 = vpop.f32.mrf.mxu0 }
  0xe1   : > { %v1985_v52 = vpop.f32.mrf.mxu0 }
  0xe2   : > { %v500_v52 = vsub.s32 %v2234_v23, %v499_v50 }
  0xe4   : > { %v952_v53 = vpop.f32.mrf.mxu0 }
  0xe6   : > { %v1999_v54 = vpop.f32.mrf.mxu0 }
  0xe8   : > { %v1135_v55 = vpop.f32.mrf.mxu0 }
  0xea   : > { %v2013_v56 = vpop.f32.mrf.mxu0 }
  0xec   : > { %v1318_v57 = vpop.f32.mrf.mxu0 }
  0xee   : > { %v2027_v58 = vpop.f32.mrf.mxu0 }
  0xf0   : > { %v1501_v59 = vpop.f32.mrf.mxu0 }
  0xf2   : > { %v2041_v60 = vpop.f32.mrf.mxu0 }
  0xf4   : > { %v1684_v61 = vpop.f32.mrf.mxu0 }
  0xf6   : > { %v2055_v62 = vpop.f32.mrf.mxu0 }
 0x152   : > { %v477_v63 = vpop.f32.mrf.mxu1 }
 0x153   : > { %v478_v0 = vadd.f32 %v477_v63, %v399_v47 }
 0x154   : > { %v1964_v1 = vpop.f32.mrf.mxu1 }
 0x155   : > { %v481_v3 = vmax.f32 %v478_v0, 0.0 }
 0x156   : > { %v662_v4 = vpop.f32.mrf.mxu1 }
 0x157   : > { %v663_v5 = vadd.f32 %v662_v4, %v586_v49  ;;  %v489_v6 = vmul.f32 %v1865_v2, %v481_v3 }
 0x158   : > { %v1978_v7 = vpop.f32.mrf.mxu1 }
 0x159   : > { %v666_v8 = vmax.f32 %v663_v5, 0.0  ;;  %v491_v9 = vsel %vm490_vm12, %v489_v6, 0.0 }
 0x15a   : > { %492 = vadd.xlane.f32.xlu0 %v491_v9  ;;  %v845_v10 = vpop.f32.mrf.mxu1 }
 0x15b   : > { %v846_v11 = vadd.f32 %v845_v10, %v769_v51  ;;  %v674_v12 = vmul.f32 %v1865_v2, %v666_v8  ;;  %v495_v51 = vstv %s494_s9 }
 0x15c   : > { %v1992_v13 = vpop.f32.mrf.mxu1 }
 0x15d   : > { %v849_v14 = vmax.f32 %v846_v11, 0.0  ;;  %v675_v15 = vsel %vm490_vm12, %v674_v12, 0.0 }
 0x15e   : > { %676 = vadd.xlane.f32.xlu1 %v675_v15  ;;  %v1028_v16 = vpop.f32.mrf.mxu1 }
 0x15f   : > { %v1029_v17 = vadd.f32 %v1028_v16, %v952_v53  ;;  %v857_v18 = vmul.f32 %v1865_v2, %v849_v14 }
 0x160   : > { %v2006_v19 = vpop.f32.mrf.mxu1 }
 0x161   : > { %v1032_v20 = vmax.f32 %v1029_v17, 0.0  ;;  %v858_v21 = vsel %vm490_vm12, %v857_v18, 0.0 }
 0x162   : > { %859 = vadd.xlane.f32.xlu0 %v858_v21  ;;  %v1211_v24 = vpop.f32.mrf.mxu1 }
 0x163   : > { %v1212_v25 = vadd.f32 %v1211_v24, %v1135_v55  ;;  %v1040_v26 = vmul.f32 %v1865_v2, %v1032_v20 }
 0x164   : > { %v2020_v27 = vpop.f32.mrf.mxu1 }
 0x165   : > { %v1215_v28 = vmax.f32 %v1212_v25, 0.0  ;;  %v1041_v29 = vsel %vm490_vm12, %v1040_v26, 0.0 }
 0x166   : > { %1042 = vadd.xlane.f32.xlu0 %v1041_v29  ;;  %v1394_v30 = vpop.f32.mrf.mxu1 }
 0x167   : > { %v1395_v31 = vadd.f32 %v1394_v30, %v1318_v57  ;;  %v1223_v32 = vmul.f32 %v1865_v2, %v1215_v28 }
 0x168   : > { %v2034_v33 = vpop.f32.mrf.mxu1 }
 0x169   : > { %v1398_v34 = vmax.f32 %v1395_v31, 0.0  ;;  %v1224_v35 = vsel %vm490_vm12, %v1223_v32, 0.0 }
 0x16a   : > { %1225 = vadd.xlane.f32.xlu1 %v1224_v35  ;;  %v1577_v36 = vpop.f32.mrf.mxu1 }
 0x16b   : > { %v1578_v37 = vadd.f32 %v1577_v36, %v1501_v59  ;;  %v1406_v38 = vmul.f32 %v1865_v2, %v1398_v34 }
 0x16c   : > { %v2048_v39 = vpop.f32.mrf.mxu1 }
 0x16d   : > { %v1581_v40 = vmax.f32 %v1578_v37, 0.0  ;;  %v1407_v41 = vsel %vm490_vm12, %v1406_v38, 0.0 }
 0x16e   : > { %1408 = vadd.xlane.f32.xlu0 %v1407_v41  ;;  %v1760_v42 = vpop.f32.mrf.mxu1 }
 0x16f   : > { %v1761_v43 = vadd.f32 %v1760_v42, %v1684_v61  ;;  %v1589_v44 = vmul.f32 %v1865_v2, %v1581_v40 }
 0x170   : > { %v2062_v45 = vpop.f32.mrf.mxu1 }
 0x171   : > { %v1764_v46 = vmax.f32 %v1761_v43, 0.0  ;;  %v1590_v47 = vsel %vm490_vm12, %v1589_v44, 0.0 }
 0x172   : > { %1591 = vadd.xlane.f32.xlu1 %v1590_v47 }
 0x173   : > { %v1772_v48 = vmul.f32 %v1865_v2, %v1764_v46 }
 0x175   : > { %v1773_v49 = vsel %vm490_vm12, %v1772_v48, 0.0 }
 0x176   : > { %1774 = vadd.xlane.f32.xlu0 %v1773_v49 }
 0x1e3   : > { %v493_v53 = vpop.xlane.xlu0 %492 }
 0x1e4   : > { %v496_v54 = vadd.f32 %v495_v51, %v493_v53 }
 0x1e6   : > { %v501_v55 = vrot.slane %v496_v54, %v500_v52 }
 0x1e7   : > { %v677_v56 = vpop.xlane.xlu1 %676 }
 0x1e8   : > { %504 = vst.msk [vmem:[%s2340_s13] sm:$0x1] %vm503_vm13, %v501_v55  ;;  %v680_v22 = vadd.f32 %v677_v56, %v495_v51 }
 0x1ea   : > { %v685_v57 = vrot.slane %v680_v22, %v500_v52 }
 0x1eb   : > { %v860_v23 = vpop.xlane.xlu0 %859 }
 0x1ec   : > { %687 = vst.msk [vmem:[%s2340_s13 + $0x1] sm:$0x1] %vm503_vm13, %v685_v57  ;;  %v863_v58 = vadd.f32 %v860_v23, %v495_v51 }
 0x1ee   : > { %v868_v59 = vrot.slane %v863_v58, %v500_v52 }
 0x1ef   : > { %v1043_v60 = vpop.xlane.xlu0 %1042 }
 0x1f0   : > { %870 = vst.msk [vmem:[%s2340_s13 + $0x2] sm:$0x1] %vm503_vm13, %v868_v59  ;;  %v1046_v61 = vadd.f32 %v1043_v60, %v495_v51 }
 0x1f2   : > { %v1051_v62 = vrot.slane %v1046_v61, %v500_v52 }
 0x1f3   : > { %v1226_v63 = vpop.xlane.xlu1 %1225 }
 0x1f4   : > { %1053 = vst.msk [vmem:[%s2340_s13 + $0x3] sm:$0x1] %vm503_vm13, %v1051_v62  ;;  %v1229_v0 = vadd.f32 %v1226_v63, %v495_v51 }
 0x1f6   : > { %v1234_v1 = vrot.slane %v1229_v0, %v500_v52 }
 0x1f7   : > { %v1409_v2 = vpop.xlane.xlu0 %1408 }
 0x1f8   : > { %1236 = vst.msk [vmem:[%s2340_s13 + $0x4] sm:$0x1] %vm503_vm13, %v1234_v1  ;;  %v1412_v3 = vadd.f32 %v1409_v2, %v495_v51 }
 0x1fa   : > { %v1417_v4 = vrot.slane %v1412_v3, %v500_v52 }
 0x1fb   : > { %v1592_v5 = vpop.xlane.xlu1 %1591 }
 0x1fc   : > { %1419 = vst.msk [vmem:[%s2340_s13 + $0x5] sm:$0x1] %vm503_vm13, %v1417_v4  ;;  %v1595_v6 = vadd.f32 %v1592_v5, %v495_v51 }
 0x1fe   : > { %v1600_v7 = vrot.slane %v1595_v6, %v500_v52 }
 0x1ff   : > { %v1775_v8 = vpop.xlane.xlu0 %1774 }
 0x200   : > { %1602 = vst.msk [vmem:[%s2340_s13 + $0x6] sm:$0x1] %vm503_vm13, %v1600_v7  ;;  %v1778_v9 = vadd.f32 %v1775_v8, %v495_v51 }
 0x202   : > { %v1783_v10 = vrot.slane %v1778_v9, %v500_v52 }
 0x204   : > { %1785 = vst.msk [vmem:[%s2340_s13 + $0x7] sm:$0x1] %vm503_vm13, %v1783_v10 }
 0x205 PF: > { %s17_s23 = sadd.s32 1, %s2082_s23  }
 0x206   : > { %p14_p5 = scmp.ge.s32.totalorder %s17_s23, 4  }
 0x208   :  { %16 = sbr.rel (!%p14_p5) target bundleno = 2 (0x2), region = 77 }

</bundles_post_ra>
